<compile_context>
chip_gen: v6e
topology: v6e:2x2x1
jax: 0.10.0
libtpu: 0.0.40
codegen_flags: <defaults>
</compile_context>

<pallas_src>
import jax
import jax.numpy as jnp
from jax.experimental import pallas as pl
from jax.experimental.pallas import tpu as pltpu

_SUBLANE = 8  # f32 sublane tile


def _lstm_kernel(x_ref, wih_ref, whh_ref, b_ref, wfc_ref, bfc_ref, out_ref):
    """Entire LSTM forward in one grid-free kernel invocation.

    x_ref:   (T*BP, I)  time-major input, batch zero-padded to BP (multiple of 8);
                        row t*BP + b == x[b, t, :]
    wih_ref: (I, 4H)    transposed weight_ih_l0
    whh_ref: (H, 4H)    transposed weight_hh_l0
    b_ref:   (1, 4H)    bias_ih_l0 + bias_hh_l0
    wfc_ref: (H, O)     transposed fc.weight
    bfc_ref: (1, O)     fc.bias
    out_ref: (B, O)     real (unpadded) batch rows only
    """
    B = out_ref.shape[0]
    TBP = x_ref.shape[0]
    H = whh_ref.shape[0]
    BP = ((B + _SUBLANE - 1) // _SUBLANE) * _SUBLANE
    T = TBP // BP

    w_hh = whh_ref[...]                                        # (H, 4H)

    # ---- Phase 1: hoisted input projection: one MXU matmul for ALL timesteps.
    pre = (jnp.dot(x_ref[...], wih_ref[...],
                   preferred_element_type=jnp.float32)
           + b_ref[...])                                       # (T*BP, 4H)

    # ---- Phase 2: sequential recurrence. T is small & static -> fully
    # unrolled loop; every `pre` slice is an aligned (BP, 4H) = (8,128) tile
    # and h/c are full-sublane vreg-resident values.
    h = jnp.zeros((BP, H), jnp.float32)
    c = jnp.zeros((BP, H), jnp.float32)
    for t in range(T):
        gates = pre[t * BP:(t + 1) * BP, :] + jnp.dot(
            h, w_hh, preferred_element_type=jnp.float32)       # (BP, 4H) [i,f,g,o]
        sig = jax.nn.sigmoid(gates)                            # 1 EUP pass
        tng = jnp.tanh(gates)                                  # 1 EUP pass
        i_g = sig[:, 0 * H:1 * H]
        f_g = sig[:, 1 * H:2 * H]
        o_g = sig[:, 3 * H:4 * H]
        g_g = tng[:, 2 * H:3 * H]
        c = f_g * c + i_g * g_g
        h = o_g * jnp.tanh(c)                                  # 1 EUP pass

    # ---- Phase 3: final Linear on the last hidden state; store real rows only.
    fc = (jnp.dot(h, wfc_ref[...], preferred_element_type=jnp.float32)
          + bfc_ref[...])                                      # (BP, O)
    out_ref[...] = fc[:B, :].astype(out_ref.dtype)


@jax.jit
def lstm_rnn_forward(x_btI, w_ih, w_hh, b_ihhh, w_fc, b_fc):
    """x_btI: (B, T, I) batch_first input, exactly like the PyTorch module.

    w_ih:   (I, 4H)  transposed weight_ih_l0
    w_hh:   (H, 4H)  transposed weight_hh_l0
    b_ihhh: (1, 4H)  bias_ih_l0 + bias_hh_l0
    w_fc:   (H, O)   transposed fc.weight
    b_fc:   (1, O)   fc.bias
    Returns (B, O) — fc applied to the last timestep's hidden state.
    """
    B, T, I = x_btI.shape
    O = w_fc.shape[1]
    BP = ((B + _SUBLANE - 1) // _SUBLANE) * _SUBLANE

    # Time-major + batch pad to the sublane tile. allow_input_fusion lets XLA
    # fold this re-layout into the pallas_call operand instead of a separate
    # launch.
    x_tm = jnp.transpose(x_btI, (1, 0, 2))                     # (T, B, I)
    x_tm = jnp.pad(x_tm, ((0, 0), (0, BP - B), (0, 0)))        # (T, BP, I)
    x_flat = x_tm.reshape(T * BP, I)                           # (T*BP, I)

    vmem = pltpu.MemorySpace.VMEM
    return pl.pallas_call(
        _lstm_kernel,
        out_shape=jax.ShapeDtypeStruct((B, O), x_btI.dtype),
        in_specs=[pl.BlockSpec(memory_space=vmem)] * 6,
        out_specs=pl.BlockSpec(memory_space=vmem),
        compiler_params=pltpu.CompilerParams(
            allow_input_fusion=[True, False, False, False, False, False]),
    )(x_flat, w_ih, w_hh, b_ihhh, w_fc, b_fc)


def _reference_forward(x, w_ih, w_hh, b, w_fc, b_fc):
    """Plain-JAX reference mirroring torch.nn.LSTM(batch_first=True) + Linear."""
    B, T, I = x.shape
    H = w_hh.shape[0]

    def step(carry, x_t):
        h, c = carry
        gates = x_t @ w_ih + h @ w_hh + b
        i_g = jax.nn.sigmoid(gates[:, 0 * H:1 * H])
        f_g = jax.nn.sigmoid(gates[:, 1 * H:2 * H])
        g_g = jnp.tanh(gates[:, 2 * H:3 * H])
        o_g = jax.nn.sigmoid(gates[:, 3 * H:4 * H])
        c_new = f_g * c + i_g * g_g
        h_new = o_g * jnp.tanh(c_new)
        return (h_new, c_new), None

    h0 = jnp.zeros((B, H), jnp.float32)
    c0 = jnp.zeros((B, H), jnp.float32)
    (h_T, _), _ = jax.lax.scan(step, (h0, c0), jnp.transpose(x, (1, 0, 2)))
    return h_T @ w_fc + b_fc


if __name__ == "__main__":
    # Small shapes consistent with the module's forward (batch_first LSTM):
    B, T = 2, 8            # batch, sequence length
    INPUT_SIZE = 16
    HIDDEN_SIZE = 32
    OUTPUT_SIZE = 8

    key = jax.random.PRNGKey(0)
    kx, k1, k2, k3, k4, k5, k6 = jax.random.split(key, 7)

    # PyTorch-style init: U(-1/sqrt(H), 1/sqrt(H)) for LSTM and Linear params.
    s = 1.0 / jnp.sqrt(jnp.float32(HIDDEN_SIZE))
    w_ih = jax.random.uniform(k1, (INPUT_SIZE, 4 * HIDDEN_SIZE), jnp.float32, -s, s)
    w_hh = jax.random.uniform(k2, (HIDDEN_SIZE, 4 * HIDDEN_SIZE), jnp.float32, -s, s)
    b_ih = jax.random.uniform(k3, (4 * HIDDEN_SIZE,), jnp.float32, -s, s)
    b_hh = jax.random.uniform(k4, (4 * HIDDEN_SIZE,), jnp.float32, -s, s)
    b_ihhh = (b_ih + b_hh).reshape(1, 4 * HIDDEN_SIZE)
    w_fc = jax.random.uniform(k5, (HIDDEN_SIZE, OUTPUT_SIZE), jnp.float32, -s, s)
    b_fc = jax.random.uniform(k6, (OUTPUT_SIZE,), jnp.float32, -s, s).reshape(1, OUTPUT_SIZE)

    x = jax.random.normal(kx, (B, T, INPUT_SIZE), jnp.float32)

    out = lstm_rnn_forward(x, w_ih, w_hh, b_ihhh, w_fc, b_fc)
    out = jax.block_until_ready(out)

    ref = _reference_forward(x, w_ih, w_hh, b_ihhh, w_fc, b_fc)
    assert out.shape == (B, OUTPUT_SIZE)
    assert jnp.allclose(out, ref, atol=1e-4, rtol=1e-4), "mismatch vs JAX reference"

    print("KERNEL_OK")
</pallas_src>

<mosaic_0001>
module attributes {stable_mosaic.version = 11 : i64} {
  func.func @_lstm_kernel(%arg0: memref<64x16xf32, #tpu.memory_space<vmem>>, %arg1: memref<16x128xf32, #tpu.memory_space<vmem>>, %arg2: memref<32x128xf32, #tpu.memory_space<vmem>>, %arg3: memref<1x128xf32, #tpu.memory_space<vmem>>, %arg4: memref<32x8xf32, #tpu.memory_space<vmem>>, %arg5: memref<1x8xf32, #tpu.memory_space<vmem>>, %arg6: memref<2x8xf32, #tpu.memory_space<vmem>>) attributes {dimension_semantics = [], scalar_prefetch = 0 : i64, scratch_operands = 0 : i64, tpu.core_type = #tpu.core_type<tc>} {
    %c0 = arith.constant 0 : index
    %c0_0 = arith.constant 0 : index
    %0 = vector.load %arg2[%c0, %c0_0] : memref<32x128xf32, #tpu.memory_space<vmem>>, vector<32x128xf32>
    %c0_1 = arith.constant 0 : index
    %c0_2 = arith.constant 0 : index
    %1 = vector.load %arg0[%c0_1, %c0_2] : memref<64x16xf32, #tpu.memory_space<vmem>>, vector<64x16xf32>
    %c0_3 = arith.constant 0 : index
    %c0_4 = arith.constant 0 : index
    %2 = vector.load %arg1[%c0_3, %c0_4] : memref<16x128xf32, #tpu.memory_space<vmem>>, vector<16x128xf32>
    %cst = arith.constant dense<0.000000e+00> : vector<64x128xf32>
    %3 = tpu.matmul %1, %2, %cst {dimension_numbers = #tpu.dot_dimension_numbers<[1], [0], [0], [1], [0, 0, 1, 1], [], []>} : vector<64x16xf32>, vector<16x128xf32>, vector<64x128xf32> -> vector<64x128xf32>
    %c0_5 = arith.constant 0 : index
    %c0_6 = arith.constant 0 : index
    %4 = vector.load %arg3[%c0_5, %c0_6] : memref<1x128xf32, #tpu.memory_space<vmem>>, vector<1x128xf32>
    %5 = vector.broadcast %4 : vector<1x128xf32> to vector<64x128xf32>
    %6 = arith.addf %3, %5 : vector<64x128xf32>
    %cst_7 = arith.constant 0.000000e+00 : f32
    %7 = vector.broadcast %cst_7 : f32 to vector<8x32xf32>
    %cst_8 = arith.constant 0.000000e+00 : f32
    %8 = vector.broadcast %cst_8 : f32 to vector<8x32xf32>
    %9 = vector.extract_strided_slice %6 {offsets = [0, 0], sizes = [8, 128], strides = [1, 1]} : vector<64x128xf32> to vector<8x128xf32>
    %cst_9 = arith.constant dense<0.000000e+00> : vector<8x128xf32>
    %10 = tpu.matmul %7, %0, %cst_9 {dimension_numbers = #tpu.dot_dimension_numbers<[1], [0], [0], [1], [0, 0, 1, 1], [], []>} : vector<8x32xf32>, vector<32x128xf32>, vector<8x128xf32> -> vector<8x128xf32>
    %11 = arith.addf %9, %10 : vector<8x128xf32>
    %12 = arith.negf %11 : vector<8x128xf32>
    %13 = math.exp %12 : vector<8x128xf32>
    %cst_10 = arith.constant 1.000000e+00 : f32
    %14 = vector.broadcast %cst_10 : f32 to vector<8x128xf32>
    %15 = arith.addf %14, %13 : vector<8x128xf32>
    %16 = arith.divf %14, %15 : vector<8x128xf32>
    %17 = math.tanh %11 : vector<8x128xf32>
    %18 = vector.extract_strided_slice %16 {offsets = [0, 0], sizes = [8, 32], strides = [1, 1]} : vector<8x128xf32> to vector<8x32xf32>
    %19 = vector.extract_strided_slice %16 {offsets = [0, 32], sizes = [8, 32], strides = [1, 1]} : vector<8x128xf32> to vector<8x32xf32>
    %20 = vector.extract_strided_slice %16 {offsets = [0, 96], sizes = [8, 32], strides = [1, 1]} : vector<8x128xf32> to vector<8x32xf32>
    %21 = vector.extract_strided_slice %17 {offsets = [0, 64], sizes = [8, 32], strides = [1, 1]} : vector<8x128xf32> to vector<8x32xf32>
    %22 = arith.mulf %19, %8 : vector<8x32xf32>
    %23 = arith.mulf %18, %21 : vector<8x32xf32>
    %24 = arith.addf %22, %23 : vector<8x32xf32>
    %25 = math.tanh %24 : vector<8x32xf32>
    %26 = arith.mulf %20, %25 : vector<8x32xf32>
    %27 = vector.extract_strided_slice %6 {offsets = [8, 0], sizes = [8, 128], strides = [1, 1]} : vector<64x128xf32> to vector<8x128xf32>
    %cst_11 = arith.constant dense<0.000000e+00> : vector<8x128xf32>
    %28 = tpu.matmul %26, %0, %cst_11 {dimension_numbers = #tpu.dot_dimension_numbers<[1], [0], [0], [1], [0, 0, 1, 1], [], []>} : vector<8x32xf32>, vector<32x128xf32>, vector<8x128xf32> -> vector<8x128xf32>
    %29 = arith.addf %27, %28 : vector<8x128xf32>
    %30 = arith.negf %29 : vector<8x128xf32>
    %31 = math.exp %30 : vector<8x128xf32>
    %cst_12 = arith.constant 1.000000e+00 : f32
    %32 = vector.broadcast %cst_12 : f32 to vector<8x128xf32>
    %33 = arith.addf %32, %31 : vector<8x128xf32>
    %34 = arith.divf %32, %33 : vector<8x128xf32>
    %35 = math.tanh %29 : vector<8x128xf32>
    %36 = vector.extract_strided_slice %34 {offsets = [0, 0], sizes = [8, 32], strides = [1, 1]} : vector<8x128xf32> to vector<8x32xf32>
    %37 = vector.extract_strided_slice %34 {offsets = [0, 32], sizes = [8, 32], strides = [1, 1]} : vector<8x128xf32> to vector<8x32xf32>
    %38 = vector.extract_strided_slice %34 {offsets = [0, 96], sizes = [8, 32], strides = [1, 1]} : vector<8x128xf32> to vector<8x32xf32>
    %39 = vector.extract_strided_slice %35 {offsets = [0, 64], sizes = [8, 32], strides = [1, 1]} : vector<8x128xf32> to vector<8x32xf32>
    %40 = arith.mulf %37, %24 : vector<8x32xf32>
    %41 = arith.mulf %36, %39 : vector<8x32xf32>
    %42 = arith.addf %40, %41 : vector<8x32xf32>
    %43 = math.tanh %42 : vector<8x32xf32>
    %44 = arith.mulf %38, %43 : vector<8x32xf32>
    %45 = vector.extract_strided_slice %6 {offsets = [16, 0], sizes = [8, 128], strides = [1, 1]} : vector<64x128xf32> to vector<8x128xf32>
    %cst_13 = arith.constant dense<0.000000e+00> : vector<8x128xf32>
    %46 = tpu.matmul %44, %0, %cst_13 {dimension_numbers = #tpu.dot_dimension_numbers<[1], [0], [0], [1], [0, 0, 1, 1], [], []>} : vector<8x32xf32>, vector<32x128xf32>, vector<8x128xf32> -> vector<8x128xf32>
    %47 = arith.addf %45, %46 : vector<8x128xf32>
    %48 = arith.negf %47 : vector<8x128xf32>
    %49 = math.exp %48 : vector<8x128xf32>
    %cst_14 = arith.constant 1.000000e+00 : f32
    %50 = vector.broadcast %cst_14 : f32 to vector<8x128xf32>
    %51 = arith.addf %50, %49 : vector<8x128xf32>
    %52 = arith.divf %50, %51 : vector<8x128xf32>
    %53 = math.tanh %47 : vector<8x128xf32>
    %54 = vector.extract_strided_slice %52 {offsets = [0, 0], sizes = [8, 32], strides = [1, 1]} : vector<8x128xf32> to vector<8x32xf32>
    %55 = vector.extract_strided_slice %52 {offsets = [0, 32], sizes = [8, 32], strides = [1, 1]} : vector<8x128xf32> to vector<8x32xf32>
    %56 = vector.extract_strided_slice %52 {offsets = [0, 96], sizes = [8, 32], strides = [1, 1]} : vector<8x128xf32> to vector<8x32xf32>
    %57 = vector.extract_strided_slice %53 {offsets = [0, 64], sizes = [8, 32], strides = [1, 1]} : vector<8x128xf32> to vector<8x32xf32>
    %58 = arith.mulf %55, %42 : vector<8x32xf32>
    %59 = arith.mulf %54, %57 : vector<8x32xf32>
    %60 = arith.addf %58, %59 : vector<8x32xf32>
    %61 = math.tanh %60 : vector<8x32xf32>
    %62 = arith.mulf %56, %61 : vector<8x32xf32>
    %63 = vector.extract_strided_slice %6 {offsets = [24, 0], sizes = [8, 128], strides = [1, 1]} : vector<64x128xf32> to vector<8x128xf32>
    %cst_15 = arith.constant dense<0.000000e+00> : vector<8x128xf32>
    %64 = tpu.matmul %62, %0, %cst_15 {dimension_numbers = #tpu.dot_dimension_numbers<[1], [0], [0], [1], [0, 0, 1, 1], [], []>} : vector<8x32xf32>, vector<32x128xf32>, vector<8x128xf32> -> vector<8x128xf32>
    %65 = arith.addf %63, %64 : vector<8x128xf32>
    %66 = arith.negf %65 : vector<8x128xf32>
    %67 = math.exp %66 : vector<8x128xf32>
    %cst_16 = arith.constant 1.000000e+00 : f32
    %68 = vector.broadcast %cst_16 : f32 to vector<8x128xf32>
    %69 = arith.addf %68, %67 : vector<8x128xf32>
    %70 = arith.divf %68, %69 : vector<8x128xf32>
    %71 = math.tanh %65 : vector<8x128xf32>
    %72 = vector.extract_strided_slice %70 {offsets = [0, 0], sizes = [8, 32], strides = [1, 1]} : vector<8x128xf32> to vector<8x32xf32>
    %73 = vector.extract_strided_slice %70 {offsets = [0, 32], sizes = [8, 32], strides = [1, 1]} : vector<8x128xf32> to vector<8x32xf32>
    %74 = vector.extract_strided_slice %70 {offsets = [0, 96], sizes = [8, 32], strides = [1, 1]} : vector<8x128xf32> to vector<8x32xf32>
    %75 = vector.extract_strided_slice %71 {offsets = [0, 64], sizes = [8, 32], strides = [1, 1]} : vector<8x128xf32> to vector<8x32xf32>
    %76 = arith.mulf %73, %60 : vector<8x32xf32>
    %77 = arith.mulf %72, %75 : vector<8x32xf32>
    %78 = arith.addf %76, %77 : vector<8x32xf32>
    %79 = math.tanh %78 : vector<8x32xf32>
    %80 = arith.mulf %74, %79 : vector<8x32xf32>
    %81 = vector.extract_strided_slice %6 {offsets = [32, 0], sizes = [8, 128], strides = [1, 1]} : vector<64x128xf32> to vector<8x128xf32>
    %cst_17 = arith.constant dense<0.000000e+00> : vector<8x128xf32>
    %82 = tpu.matmul %80, %0, %cst_17 {dimension_numbers = #tpu.dot_dimension_numbers<[1], [0], [0], [1], [0, 0, 1, 1], [], []>} : vector<8x32xf32>, vector<32x128xf32>, vector<8x128xf32> -> vector<8x128xf32>
    %83 = arith.addf %81, %82 : vector<8x128xf32>
    %84 = arith.negf %83 : vector<8x128xf32>
    %85 = math.exp %84 : vector<8x128xf32>
    %cst_18 = arith.constant 1.000000e+00 : f32
    %86 = vector.broadcast %cst_18 : f32 to vector<8x128xf32>
    %87 = arith.addf %86, %85 : vector<8x128xf32>
    %88 = arith.divf %86, %87 : vector<8x128xf32>
    %89 = math.tanh %83 : vector<8x128xf32>
    %90 = vector.extract_strided_slice %88 {offsets = [0, 0], sizes = [8, 32], strides = [1, 1]} : vector<8x128xf32> to vector<8x32xf32>
    %91 = vector.extract_strided_slice %88 {offsets = [0, 32], sizes = [8, 32], strides = [1, 1]} : vector<8x128xf32> to vector<8x32xf32>
    %92 = vector.extract_strided_slice %88 {offsets = [0, 96], sizes = [8, 32], strides = [1, 1]} : vector<8x128xf32> to vector<8x32xf32>
    %93 = vector.extract_strided_slice %89 {offsets = [0, 64], sizes = [8, 32], strides = [1, 1]} : vector<8x128xf32> to vector<8x32xf32>
    %94 = arith.mulf %91, %78 : vector<8x32xf32>
    %95 = arith.mulf %90, %93 : vector<8x32xf32>
    %96 = arith.addf %94, %95 : vector<8x32xf32>
    %97 = math.tanh %96 : vector<8x32xf32>
    %98 = arith.mulf %92, %97 : vector<8x32xf32>
    %99 = vector.extract_strided_slice %6 {offsets = [40, 0], sizes = [8, 128], strides = [1, 1]} : vector<64x128xf32> to vector<8x128xf32>
    %cst_19 = arith.constant dense<0.000000e+00> : vector<8x128xf32>
    %100 = tpu.matmul %98, %0, %cst_19 {dimension_numbers = #tpu.dot_dimension_numbers<[1], [0], [0], [1], [0, 0, 1, 1], [], []>} : vector<8x32xf32>, vector<32x128xf32>, vector<8x128xf32> -> vector<8x128xf32>
    %101 = arith.addf %99, %100 : vector<8x128xf32>
    %102 = arith.negf %101 : vector<8x128xf32>
    %103 = math.exp %102 : vector<8x128xf32>
    %cst_20 = arith.constant 1.000000e+00 : f32
    %104 = vector.broadcast %cst_20 : f32 to vector<8x128xf32>
    %105 = arith.addf %104, %103 : vector<8x128xf32>
    %106 = arith.divf %104, %105 : vector<8x128xf32>
    %107 = math.tanh %101 : vector<8x128xf32>
    %108 = vector.extract_strided_slice %106 {offsets = [0, 0], sizes = [8, 32], strides = [1, 1]} : vector<8x128xf32> to vector<8x32xf32>
    %109 = vector.extract_strided_slice %106 {offsets = [0, 32], sizes = [8, 32], strides = [1, 1]} : vector<8x128xf32> to vector<8x32xf32>
    %110 = vector.extract_strided_slice %106 {offsets = [0, 96], sizes = [8, 32], strides = [1, 1]} : vector<8x128xf32> to vector<8x32xf32>
    %111 = vector.extract_strided_slice %107 {offsets = [0, 64], sizes = [8, 32], strides = [1, 1]} : vector<8x128xf32> to vector<8x32xf32>
    %112 = arith.mulf %109, %96 : vector<8x32xf32>
    %113 = arith.mulf %108, %111 : vector<8x32xf32>
    %114 = arith.addf %112, %113 : vector<8x32xf32>
    %115 = math.tanh %114 : vector<8x32xf32>
    %116 = arith.mulf %110, %115 : vector<8x32xf32>
    %117 = vector.extract_strided_slice %6 {offsets = [48, 0], sizes = [8, 128], strides = [1, 1]} : vector<64x128xf32> to vector<8x128xf32>
    %cst_21 = arith.constant dense<0.000000e+00> : vector<8x128xf32>
    %118 = tpu.matmul %116, %0, %cst_21 {dimension_numbers = #tpu.dot_dimension_numbers<[1], [0], [0], [1], [0, 0, 1, 1], [], []>} : vector<8x32xf32>, vector<32x128xf32>, vector<8x128xf32> -> vector<8x128xf32>
    %119 = arith.addf %117, %118 : vector<8x128xf32>
    %120 = arith.negf %119 : vector<8x128xf32>
    %121 = math.exp %120 : vector<8x128xf32>
    %cst_22 = arith.constant 1.000000e+00 : f32
    %122 = vector.broadcast %cst_22 : f32 to vector<8x128xf32>
    %123 = arith.addf %122, %121 : vector<8x128xf32>
    %124 = arith.divf %122, %123 : vector<8x128xf32>
    %125 = math.tanh %119 : vector<8x128xf32>
    %126 = vector.extract_strided_slice %124 {offsets = [0, 0], sizes = [8, 32], strides = [1, 1]} : vector<8x128xf32> to vector<8x32xf32>
    %127 = vector.extract_strided_slice %124 {offsets = [0, 32], sizes = [8, 32], strides = [1, 1]} : vector<8x128xf32> to vector<8x32xf32>
    %128 = vector.extract_strided_slice %124 {offsets = [0, 96], sizes = [8, 32], strides = [1, 1]} : vector<8x128xf32> to vector<8x32xf32>
    %129 = vector.extract_strided_slice %125 {offsets = [0, 64], sizes = [8, 32], strides = [1, 1]} : vector<8x128xf32> to vector<8x32xf32>
    %130 = arith.mulf %127, %114 : vector<8x32xf32>
    %131 = arith.mulf %126, %129 : vector<8x32xf32>
    %132 = arith.addf %130, %131 : vector<8x32xf32>
    %133 = math.tanh %132 : vector<8x32xf32>
    %134 = arith.mulf %128, %133 : vector<8x32xf32>
    %135 = vector.extract_strided_slice %6 {offsets = [56, 0], sizes = [8, 128], strides = [1, 1]} : vector<64x128xf32> to vector<8x128xf32>
    %cst_23 = arith.constant dense<0.000000e+00> : vector<8x128xf32>
    %136 = tpu.matmul %134, %0, %cst_23 {dimension_numbers = #tpu.dot_dimension_numbers<[1], [0], [0], [1], [0, 0, 1, 1], [], []>} : vector<8x32xf32>, vector<32x128xf32>, vector<8x128xf32> -> vector<8x128xf32>
    %137 = arith.addf %135, %136 : vector<8x128xf32>
    %138 = arith.negf %137 : vector<8x128xf32>
    %139 = math.exp %138 : vector<8x128xf32>
    %cst_24 = arith.constant 1.000000e+00 : f32
    %140 = vector.broadcast %cst_24 : f32 to vector<8x128xf32>
    %141 = arith.addf %140, %139 : vector<8x128xf32>
    %142 = arith.divf %140, %141 : vector<8x128xf32>
    %143 = math.tanh %137 : vector<8x128xf32>
    %144 = vector.extract_strided_slice %142 {offsets = [0, 0], sizes = [8, 32], strides = [1, 1]} : vector<8x128xf32> to vector<8x32xf32>
    %145 = vector.extract_strided_slice %142 {offsets = [0, 32], sizes = [8, 32], strides = [1, 1]} : vector<8x128xf32> to vector<8x32xf32>
    %146 = vector.extract_strided_slice %142 {offsets = [0, 96], sizes = [8, 32], strides = [1, 1]} : vector<8x128xf32> to vector<8x32xf32>
    %147 = vector.extract_strided_slice %143 {offsets = [0, 64], sizes = [8, 32], strides = [1, 1]} : vector<8x128xf32> to vector<8x32xf32>
    %148 = arith.mulf %145, %132 : vector<8x32xf32>
    %149 = arith.mulf %144, %147 : vector<8x32xf32>
    %150 = arith.addf %148, %149 : vector<8x32xf32>
    %151 = math.tanh %150 : vector<8x32xf32>
    %152 = arith.mulf %146, %151 : vector<8x32xf32>
    %c0_25 = arith.constant 0 : index
    %c0_26 = arith.constant 0 : index
    %153 = vector.load %arg4[%c0_25, %c0_26] : memref<32x8xf32, #tpu.memory_space<vmem>>, vector<32x8xf32>
    %cst_27 = arith.constant dense<0.000000e+00> : vector<8x8xf32>
    %154 = tpu.matmul %152, %153, %cst_27 {dimension_numbers = #tpu.dot_dimension_numbers<[1], [0], [0], [1], [0, 0, 1, 1], [], []>} : vector<8x32xf32>, vector<32x8xf32>, vector<8x8xf32> -> vector<8x8xf32>
    %c0_28 = arith.constant 0 : index
    %c0_29 = arith.constant 0 : index
    %155 = vector.load %arg5[%c0_28, %c0_29] : memref<1x8xf32, #tpu.memory_space<vmem>>, vector<1x8xf32>
    %156 = vector.broadcast %155 : vector<1x8xf32> to vector<8x8xf32>
    %157 = arith.addf %154, %156 : vector<8x8xf32>
    %158 = vector.extract_strided_slice %157 {offsets = [0, 0], sizes = [2, 8], strides = [1, 1]} : vector<8x8xf32> to vector<2x8xf32>
    %c0_30 = arith.constant 0 : index
    %c0_31 = arith.constant 0 : index
    %159 = vector.load %arg6[%c0_30, %c0_31] : memref<2x8xf32, #tpu.memory_space<vmem>>, vector<2x8xf32>
    tpu.vector_store %arg6[%c0_30, %c0_31], %158 {strides = array<i32>} : memref<2x8xf32, #tpu.memory_space<vmem>>, vector<2x8xf32>,
    return
  }
}

</mosaic_0001>

<bundles_post_ra>
// kernel: lstm_rnn_forward.2
= control target key start
LH: loop header
LB: loop body
LE: loop exit
PB: predicated region body
PF: predicated region fallthrough
CT: control target
= control target key end

     0   :  { %s1834_s0 = inlined_call_operand.vmem [shape: f32[16,128], index: 0, kind: input, shape index: {}]   ;;  %s1835_s1 = inlined_call_operand.vmem [shape: f32[32,128], index: 1, kind: input, shape index: {}]   ;;  %s1836_s2 = inlined_call_operand.vmem [shape: f32[1,128], index: 2, kind: input, shape index: {}]   ;;  %s1837_s3 = inlined_call_operand.vmem [shape: f32[32,8], index: 3, kind: input, shape index: {}]   ;;  %s1838_s4 = inlined_call_operand.vmem [shape: f32[1,8], index: 4, kind: input, shape index: {}]   ;;  %s1839_s5 = inlined_call_operand.vmem [shape: f32[8,2,16], index: 5, kind: input, shape index: {}]   ;;  %s1840_s6 = inlined_call_operand.<no memory space> [shape: f32[], index: 6, kind: input, shape index: {}]   ;;  %s1841_s7 = inlined_call_operand.hbm [shape: f32[2,8], index: 7, kind: output, shape index: {}]  }
   0x1   :  { %v1546_v0 = vstv %s1840_s6 }
   0x2   :  { %v1551_v1 = vld [vmem:[%s1835_s1 + $0x18] sm:$0xff]  ;;  %v165_v2 = vld [vmem:[%s1834_s0 + $0x8] sm:$0xff]  ;;  %v27_v3 = vlaneseq  ;;  %v1498_v4 = vmov 0.0   ;;  %v1560_v5 = vld [vmem:[%s1835_s1 + $0x10] sm:$0xff] }
   0x3   :  { %1308 = vmatprep.subr.mxu1 %v1498_v4  ;;  %1292 = vmatprep.subr.mxu0 %v165_v2  ;;  %v164_v6 = vld [vmem:[%s1834_s0] sm:$0xff]  ;;  %v1580_v11 = vld [vmem:[%s1835_s1 + $0x8] sm:$0xff] }
   0x4   :  { %1309 = vmatpush3.msra.mxu1 %v1551_v1  ;;  %1293 = vmatpush3.msra.mxu0 %v165_v2  ;;  %v26_v7 = vld [vmem:[%s1839_s5] sm:$0x3]  ;;  %v1569_v8 = vshrl.u32 %v27_v3, 7  ;;  %v1571_v9 = vand.u32 127, %v27_v3  ;;  %v1204_v10 = vld [vmem:[%s1839_s5 + $0x2] sm:$0x3] }
   0x5   :  { %1310 = vmatprep.subr.mxu1 %v1498_v4  ;;  %1294 = vmatprep.subr.mxu0 %v164_v6 }
   0x6   :  { %13 = vsyncpa [#allocation8], 0  ;;  %1311 = vmatpush3.msra.mxu1 %v1560_v5  ;;  %1295 = vmatpush3.msra.mxu0 %v164_v6  ;;  %vm30_vm0 = vcmp.lt.s32.totalorder %v1569_v8, 2  ;;  %vm35_vm1 = vcmp.lt.s32.totalorder %v1571_v9, 16  ;;  %vm173_vm2 = vcmask 130048   ;;  %v1595_v14 = vld [vmem:[%s1835_s1] sm:$0xff] }
   0x7   :  { %1312 = vmatprep.subr.mxu1 %v1498_v4  ;;  %v31_v12 = vsel %vm30_vm0, %v26_v7, %v1546_v0  ;;  %v46_v13 = vsel %vm30_vm0, %v1204_v10, %v1546_v0  ;;  %vm1499_vm3 = vmmov 0   ;;  %1330 = vmatprep.subr.mxu0 %v1498_v4  ;;  %v1634_v19 = vld [vmem:[%s1836_s2] ss:$0 sm:$0xff]  ;;  %s1500_s18 = smov 64   ;;  %s1501_s2 = smov 32   ;;  %vm303_vm4 = vcmask 261120  }
   0x8   :  { %1316 = vmatprep.mubr.msk.f32.mxu1 %vm1499_vm3, %v1498_v4  ;;  %v36_v15 = vsel %vm35_vm1, %v31_v12, %v1546_v0  ;;  %1313 = vmatpush3.msra.mxu1 %v1580_v11  ;;  %v51_v16 = vsel %vm35_vm1, %v46_v13, %v1546_v0  ;;  %v1205_v52 = vld [vmem:[%s1839_s5 + $0x4] sm:$0x3]  ;;  %v1206_v53 = vld [vmem:[%s1839_s5 + $0x6] sm:$0x3]  ;;  %v1207_v54 = vld [vmem:[%s1839_s5 + $0x8] sm:$0x3] }
   0x9   :  { %1296 = vmatprep.mubr.msk.f32.mxu0 %vm173_vm2, %v36_v15  ;;  %1314 = vmatprep.subr.mxu1 %v1498_v4  ;;  %v62_v55 = vsel %vm30_vm0, %v1205_v52, %v1546_v0  ;;  %v78_v56 = vsel %vm30_vm0, %v1206_v53, %v1546_v0  ;;  %v94_v57 = vsel %vm30_vm0, %v1207_v54, %v1546_v0  ;;  %v1208_v58 = vld [vmem:[%s1839_s5 + $0xa] sm:$0x3]  ;;  %v1209_v59 = vld [vmem:[%s1839_s5 + $0xc] sm:$0x3]  ;;  %v1210_v3 = vld [vmem:[%s1839_s5 + $0xe] sm:$0x3] }
   0xa   :  { %1297 = vmatmul.mubr.msk.f32.vlgmr.msra.gmra.mxu0 %vm173_vm2, %v51_v16  ;;  %1315 = vmatpush3.msra.mxu1 %v1595_v14  ;;  %v67_v60 = vsel %vm35_vm1, %v62_v55, %v1546_v0  ;;  %v83_v61 = vsel %vm35_vm1, %v78_v56, %v1546_v0  ;;  %v99_v62 = vsel %vm35_vm1, %v94_v57, %v1546_v0  ;;  %s1502_s15 = smov [#allocation7]   ;;  %vm1188_vm5 = vcmask 58368  }
   0xb   :  { %1317 = vmatmul.mubr.f32.vlgmr.msra.gmra.mxu1 %v1498_v4  ;;  %1319 = vmatprep.subr.mxu1 %v1498_v4  ;;  %v110_v63 = vsel %vm30_vm0, %v1208_v58, %v1546_v0  ;;  %v126_v2 = vsel %vm30_vm0, %v1209_v59, %v1546_v0  ;;  %v142_v10 = vsel %vm30_vm0, %v1210_v3, %v1546_v0 }
   0xc   :  { %1320 = vmatpush3.msra.mxu1 %v1551_v1  ;;  %1327 = vmatprep.mubr.msk.f32.mxu1 %vm1499_vm3, %v1498_v4  ;;  %v115_v6 = vsel %vm35_vm1, %v110_v63, %v1546_v0  ;;  %v131_v7 = vsel %vm35_vm1, %v126_v2, %v1546_v0  ;;  %v147_v12 = vsel %vm35_vm1, %v142_v10, %v1546_v0 }
   0xd   :  { %1321 = vmatprep.subr.mxu1 %v1498_v4  ;;  %1331 = vmatpush3.msra.mxu0 %v1551_v1 }
   0xe   :  { %1322 = vmatpush3.msra.mxu1 %v1560_v5  ;;  %1332 = vmatprep.subr.mxu0 %v1498_v4 }
   0xf   :  { %1323 = vmatprep.subr.mxu1 %v1498_v4  ;;  %1333 = vmatpush3.msra.mxu0 %v1560_v5 }
  0x10   :  { %1324 = vmatpush3.msra.mxu1 %v1580_v11  ;;  %1334 = vmatprep.subr.mxu0 %v1498_v4 }
  0x11   :  { %1325 = vmatprep.subr.mxu1 %v1498_v4  ;;  %1335 = vmatpush3.msra.mxu0 %v1580_v11 }
  0x12   :  { %1326 = vmatpush3.msra.mxu1 %v1595_v14  ;;  %1336 = vmatprep.subr.mxu0 %v1498_v4 }
  0x13   :  { %1337 = vmatpush3.msra.mxu0 %v1595_v14  ;;  %1341 = vmatprep.subr.mxu1 %v1498_v4 }
  0x14   :  { %1352 = vmatprep.subr.mxu0 %v1498_v4  ;;  %1299 = vmatprep.mubr.msk.f32.mxu0 %vm173_vm2, %v67_v60 }
  0x15   :  { %1300 = vmatmul.mubr.msk.f32.gmra.mxu0 %vm173_vm2, %v83_v61 }
  0x16   :  { %1302 = vmatprep.mubr.msk.f32.mxu0 %vm173_vm2, %v99_v62 }
  0x19   :  { %1303 = vmatmul.mubr.msk.f32.gmra.mxu0 %vm173_vm2, %v115_v6 }
  0x1a   :  { %1305 = vmatprep.mubr.msk.f32.mxu0 %vm173_vm2, %v131_v7 }
  0x1d   :  { %1306 = vmatmul.mubr.msk.f32.gmra.mxu0 %vm173_vm2, %v147_v12 }
  0x1e   :  { %1338 = vmatprep.mubr.msk.f32.mxu0 %vm1499_vm3, %v1498_v4 }
  0xca   :  { %v1298_v17 = vpop.f32.mrf.mxu0 }
  0xcb   :  { %v373_v18 = vpop.f32.mrf.mxu1  ;;  %v270_v38 = vadd.f32 %v1298_v17, %v1634_v19 }
  0xcc   :  { %v264_v20 = vpop.f32.mrf.mxu0 }
  0xcd   :  { %v265_v21 = vadd.f32 %v1634_v19, %v264_v20  ;;  %v1318_v22 = vpop.f32.mrf.mxu1 }
  0xcf   :  { %v377_v23 = vadd.f32 %v373_v18, %v265_v21 }
  0xd1   :  { %1412 = vtanh.f32 %v377_v23  ;;  %v1220_v25 = vmul.f32 -1.442695, %v377_v23 }
  0xd3   :  { %1414 = vpow2.f32 %v1220_v25 }
  0xd5   :  { %v1301_v0 = vpop.f32.mrf.mxu0 }
  0xd7   :  { %v274_v9 = vpop.f32.mrf.mxu0 }
  0xd8   :  { %v275_v22 = vadd.f32 %v1634_v19, %v274_v9 }
  0xd9   :  { %v1733_v17 = vpop.f32.mrf.mxu0 }
  0xdb   :  { %v1735_v18 = vpop.f32.mrf.mxu0 }
  0xdc   :  { %v285_v58 = vadd.f32 %v1634_v19, %v1735_v18  ;;  %v290_v18 = vadd.f32 %v1733_v17, %v1634_v19 }
  0xdd   :  { %v1737_v20 = vpop.f32.mrf.mxu0 }
  0xde   :  { %v1413_v24 = vpop.eup %1412 }
  0xdf   :  { %387 = vrot.lane.b32.xlu0 %v1413_v24, %s1500_s18  ;;  %v1739_v21 = vpop.f32.mrf.mxu0 }
  0xe0   :  { %v1415_v26 = vpop.eup %1414 }
  0xe1   :  { %v381_v27 = vadd.f32 1.0, %v1415_v26 }
  0xe3   :  { %1416 = vrcp.f32 %v381_v27 }
  0xf0   :  { %v1417_v28 = vpop.eup %1416 }
  0xf1   :  { %v385_v31 = vmul.f32 0.0, %v1417_v28 }
 0x151   :  { %v388_v29 = vpop.permute.xlu0 %387 }
 0x152   :  { %v390_v30 = vmul.f32 %v1417_v28, %v388_v29 }
 0x154   :  { %392 = vrot.lane.b32.xlu0 %v390_v30, %s1501_s2 }
 0x1c6   :  { %v393_v32 = vpop.permute.xlu0 %392 }
 0x1c7   :  { %v395_v33 = vadd.f32 %v393_v32, %v385_v31 }
 0x1c9   :  { %1418 = vtanh.f32 %v395_v33 }
 0x1d6   :  { %v1419_v34 = vpop.eup %1418 }
 0x1d7   :  { %398 = vrot.lane.b32.xlu1 %v1419_v34, %s1500_s18 }
 0x249   :  { %v399_v35 = vpop.permute.xlu1 %398 }
 0x24a   :  { %v401_v36 = vmul.f32 %v1417_v28, %v399_v35 }
 0x24c   :  { %403 = vrot.lane.b32.xlu1 %v401_v36, %s1501_s2 }
 0x2be   :  { %v404_v37 = vpop.permute.xlu1 %403 }
 0x2bf   :  { %1328 = vmatmul.mubr.msk.f32.vlgmr.msra.gmra.mxu1 %vm303_vm4, %v404_v37 }
 0x2c0   :  { %1342 = vmatpush3.msra.mxu1 %v1551_v1  ;;  %1349 = vmatprep.mubr.msk.f32.mxu1 %vm1499_vm3, %v1498_v4 }
 0x2c1   :  { %1343 = vmatprep.subr.mxu1 %v1498_v4 }
 0x2c2   :  { %1344 = vmatpush3.msra.mxu1 %v1560_v5 }
 0x2c3   :  { %1345 = vmatprep.subr.mxu1 %v1498_v4 }
 0x2c4   :  { %1346 = vmatpush3.msra.mxu1 %v1580_v11 }
 0x2c5   :  { %1347 = vmatprep.subr.mxu1 %v1498_v4 }
 0x2c6   :  { %1348 = vmatpush3.msra.mxu1 %v1595_v14 }
 0x2c7   :  { %1363 = vmatprep.subr.mxu1 %v1498_v4 }
 0x37f   :  { %v473_v39 = vpop.f32.mrf.mxu1 }
 0x380   :  { %v477_v40 = vadd.f32 %v473_v39, %v270_v38 }
 0x381   :  { %v1329_v41 = vpop.f32.mrf.mxu1 }
 0x382   :  { %1420 = vtanh.f32 %v477_v40  ;;  %v1222_v43 = vmul.f32 -1.442695, %v477_v40  ;;  %v280_v40 = vadd.f32 %v1301_v0, %v1634_v19 }
 0x384   :  { %1422 = vpow2.f32 %v1222_v43 }
 0x38f   :  { %v1421_v42 = vpop.eup %1420 }
 0x390   :  { %487 = vrot.lane.b32.xlu0 %v1421_v42, %s1500_s18 }
 0x391   :  { %v1423_v44 = vpop.eup %1422 }
 0x392   :  { %v481_v45 = vadd.f32 1.0, %v1423_v44 }
 0x394   :  { %1424 = vrcp.f32 %v481_v45 }
 0x3a1   :  { %v1425_v46 = vpop.eup %1424 }
 0x3a2   :  { %v485_v49 = vmul.f32 %v1425_v46, %v395_v33 }
 0x402   :  { %v488_v47 = vpop.permute.xlu0 %487 }
 0x403   :  { %v490_v48 = vmul.f32 %v1425_v46, %v488_v47 }
 0x405   :  { %492 = vrot.lane.b32.xlu1 %v490_v48, %s1501_s2 }
 0x477   :  { %v493_v50 = vpop.permute.xlu1 %492 }
 0x478   :  { %v1655_v51 = vadd.f32 %v493_v50, %v485_v49 }
 0x47a   :  { %1426 = vtanh.f32 %v1655_v51 }
 0x487   :  { %v1427_v13 = vpop.eup %1426 }
 0x488   :  { %498 = vrot.lane.b32.xlu0 %v1427_v13, %s1500_s18 }
 0x4fa   :  { %v499_v15 = vpop.permute.xlu0 %498 }
 0x4fb   :  { %v501_v16 = vmul.f32 %v1425_v46, %v499_v15 }
 0x4fd   :  { %503 = vrot.lane.b32.xlu1 %v501_v16, %s1501_s2 }
 0x56f   :  { %v504_v8 = vpop.permute.xlu1 %503 }
 0x570   :  { %1339 = vmatmul.mubr.msk.f32.vlgmr.msra.gmra.mxu0 %vm303_vm4, %v504_v8 }
 0x571   :  { %1353 = vmatpush3.msra.mxu0 %v1551_v1  ;;  %1360 = vmatprep.mubr.msk.f32.mxu0 %vm1499_vm3, %v1498_v4 }
 0x572   :  { %1354 = vmatprep.subr.mxu0 %v1498_v4 }
 0x573   :  { %1355 = vmatpush3.msra.mxu0 %v1560_v5 }
 0x574   :  { %1356 = vmatprep.subr.mxu0 %v1498_v4 }
 0x575   :  { %1357 = vmatpush3.msra.mxu0 %v1580_v11 }
 0x576   :  { %1358 = vmatprep.subr.mxu0 %v1498_v4 }
 0x577   :  { %1359 = vmatpush3.msra.mxu0 %v1595_v14 }
 0x578   :  { %1374 = vmatprep.subr.mxu0 %v1498_v4 }
 0x630   :  { %v573_v23 = vpop.f32.mrf.mxu0 }
 0x631   :  { %v577_v24 = vadd.f32 %v573_v23, %v275_v22 }
 0x632   :  { %v1340_v25 = vpop.f32.mrf.mxu0 }
 0x633   :  { %1428 = vtanh.f32 %v577_v24  ;;  %v1224_v27 = vmul.f32 -1.442695, %v577_v24 }
 0x635   :  { %1430 = vpow2.f32 %v1224_v27 }
 0x640   :  { %v1429_v26 = vpop.eup %1428 }
 0x641   :  { %587 = vrot.lane.b32.xlu0 %v1429_v26, %s1500_s18 }
 0x642   :  { %v1431_v28 = vpop.eup %1430 }
 0x643   :  { %v581_v29 = vadd.f32 1.0, %v1431_v28 }
 0x645   :  { %1432 = vrcp.f32 %v581_v29 }
 0x652   :  { %v1433_v30 = vpop.eup %1432 }
 0x653   :  { %v585_v33 = vmul.f32 %v1433_v30, %v1655_v51 }
 0x6b3   :  { %v588_v31 = vpop.permute.xlu0 %587 }
 0x6b4   :  { %v590_v32 = vmul.f32 %v1433_v30, %v588_v31 }
 0x6b6   :  { %592 = vrot.lane.b32.xlu1 %v590_v32, %s1501_s2 }
 0x728   :  { %v593_v34 = vpop.permute.xlu1 %592 }
 0x729   :  { %v595_v35 = vadd.f32 %v593_v34, %v585_v33  ;;  %v295_v34 = vadd.f32 %v1634_v19, %v1739_v21 }
 0x72b   :  { %1434 = vtanh.f32 %v595_v35 }
 0x738   :  { %v1435_v36 = vpop.eup %1434 }
 0x739   :  { %598 = vrot.lane.b32.xlu0 %v1435_v36, %s1500_s18 }
 0x7ab   :  { %v599_v37 = vpop.permute.xlu0 %598 }
 0x7ac   :  { %v601_v38 = vmul.f32 %v1433_v30, %v599_v37 }
 0x7ae   :  { %603 = vrot.lane.b32.xlu1 %v601_v38, %s1501_s2 }
 0x820   :  { %v604_v39 = vpop.permute.xlu1 %603 }
 0x821   :  { %1350 = vmatmul.mubr.msk.f32.vlgmr.msra.gmra.mxu1 %vm303_vm4, %v604_v39 }
 0x822   :  { %1364 = vmatpush3.msra.mxu1 %v1551_v1  ;;  %1371 = vmatprep.mubr.msk.f32.mxu1 %vm1499_vm3, %v1498_v4 }
 0x823   :  { %1365 = vmatprep.subr.mxu1 %v1498_v4 }
 0x824   :  { %1366 = vmatpush3.msra.mxu1 %v1560_v5 }
 0x825   :  { %1367 = vmatprep.subr.mxu1 %v1498_v4 }
 0x826   :  { %1368 = vmatpush3.msra.mxu1 %v1580_v11 }
 0x827   :  { %1369 = vmatprep.subr.mxu1 %v1498_v4 }
 0x828   :  { %1370 = vmatpush3.msra.mxu1 %v1595_v14 }
 0x829   :  { %1385 = vmatprep.subr.mxu1 %v1498_v4 }
 0x8e1   :  { %v673_v41 = vpop.f32.mrf.mxu1 }
 0x8e2   :  { %v677_v42 = vadd.f32 %v673_v41, %v280_v40 }
 0x8e3   :  { %v1351_v43 = vpop.f32.mrf.mxu1 }
 0x8e4   :  { %1436 = vtanh.f32 %v677_v42  ;;  %v1226_v45 = vmul.f32 -1.442695, %v677_v42 }
 0x8e6   :  { %1438 = vpow2.f32 %v1226_v45 }
 0x8f1   :  { %v1437_v44 = vpop.eup %1436 }
 0x8f2   :  { %687 = vrot.lane.b32.xlu0 %v1437_v44, %s1500_s18 }
 0x8f3   :  { %v1439_v46 = vpop.eup %1438 }
 0x8f4   :  { %v681_v47 = vadd.f32 1.0, %v1439_v46 }
 0x8f6   :  { %1440 = vrcp.f32 %v681_v47 }
 0x903   :  { %v1441_v48 = vpop.eup %1440 }
 0x904   :  { %v685_v51 = vmul.f32 %v1441_v48, %v595_v35 }
 0x964   :  { %v688_v49 = vpop.permute.xlu0 %687 }
 0x965   :  { %v690_v50 = vmul.f32 %v1441_v48, %v688_v49 }
 0x967   :  { %692 = vrot.lane.b32.xlu1 %v690_v50, %s1501_s2 }
 0x9d9   :  { %v693_v52 = vpop.permute.xlu1 %692 }
 0x9da   :  { %v695_v53 = vadd.f32 %v693_v52, %v685_v51  ;;  %v300_v51 = vadd.f32 %v1737_v20, %v1634_v19  ;;  %v1105_v20 = vld [vmem:[%s1837_s3 + $0x18] sm:$0xff] }
 0x9dc   :  { %1442 = vtanh.f32 %v695_v53 }
 0x9e9   :  { %v1443_v54 = vpop.eup %1442 }
 0x9ea   :  { %698 = vrot.lane.b32.xlu0 %v1443_v54, %s1500_s18 }
 0xa5c   :  { %v699_v55 = vpop.permute.xlu0 %698 }
 0xa5d   :  { %v701_v56 = vmul.f32 %v1441_v48, %v699_v55 }
 0xa5f   :  { %703 = vrot.lane.b32.xlu1 %v701_v56, %s1501_s2 }
 0xad1   :  { %v704_v57 = vpop.permute.xlu1 %703 }
 0xad2   :  { %1361 = vmatmul.mubr.msk.f32.vlgmr.msra.gmra.mxu0 %vm303_vm4, %v704_v57 }
 0xad3   :  { %1375 = vmatpush3.msra.mxu0 %v1551_v1  ;;  %1382 = vmatprep.mubr.msk.f32.mxu0 %vm1499_vm3, %v1498_v4 }
 0xad4   :  { %1376 = vmatprep.subr.mxu0 %v1498_v4 }
 0xad5   :  { %1377 = vmatpush3.msra.mxu0 %v1560_v5 }
 0xad6   :  { %1378 = vmatprep.subr.mxu0 %v1498_v4 }
 0xad7   :  { %1379 = vmatpush3.msra.mxu0 %v1580_v11 }
 0xad8   :  { %1380 = vmatprep.subr.mxu0 %v1498_v4 }
 0xad9   :  { %1381 = vmatpush3.msra.mxu0 %v1595_v14 }
 0xada   :  { %1396 = vmatprep.subr.mxu0 %v1498_v4 }
 0xb92   :  { %v773_v59 = vpop.f32.mrf.mxu0 }
 0xb93   :  { %v777_v60 = vadd.f32 %v773_v59, %v285_v58 }
 0xb94   :  { %v1362_v61 = vpop.f32.mrf.mxu0 }
 0xb95   :  { %1444 = vtanh.f32 %v777_v60  ;;  %v1228_v63 = vmul.f32 -1.442695, %v777_v60 }
 0xb97   :  { %1446 = vpow2.f32 %v1228_v63 }
 0xba2   :  { %v1445_v62 = vpop.eup %1444 }
 0xba3   :  { %787 = vrot.lane.b32.xlu0 %v1445_v62, %s1500_s18 }
 0xba4   :  { %v1447_v2 = vpop.eup %1446 }
 0xba5   :  { %v781_v3 = vadd.f32 1.0, %v1447_v2  ;;  %v1104_v2 = vld [vmem:[%s1837_s3 + $0x10] sm:$0xff] }
 0xba7   :  { %1448 = vrcp.f32 %v781_v3  ;;  %v1103_v3 = vld [vmem:[%s1837_s3 + $0x8] sm:$0xff] }
 0xbb4   :  { %v1449_v6 = vpop.eup %1448 }
 0xbb5   :  { %v785_v12 = vmul.f32 %v1449_v6, %v695_v53 }
 0xc15   :  { %v788_v7 = vpop.permute.xlu0 %787 }
 0xc16   :  { %v790_v10 = vmul.f32 %v1449_v6, %v788_v7 }
 0xc18   :  { %792 = vrot.lane.b32.xlu1 %v790_v10, %s1501_s2 }
 0xc8a   :  { %v793_v13 = vpop.permute.xlu1 %792 }
 0xc8b   :  { %v795_v15 = vadd.f32 %v793_v13, %v785_v12 }
 0xc8d   :  { %1450 = vtanh.f32 %v795_v15 }
 0xc9a   :  { %v1451_v16 = vpop.eup %1450 }
 0xc9b   :  { %798 = vrot.lane.b32.xlu0 %v1451_v16, %s1500_s18 }
 0xd0d   :  { %v799_v8 = vpop.permute.xlu0 %798 }
 0xd0e   :  { %v801_v0 = vmul.f32 %v1449_v6, %v799_v8  ;;  %v1102_v6 = vld [vmem:[%s1837_s3] sm:$0xff]  ;;  %s1196_s3 = sshll.u32 %s1502_s15, 4  ;;  %s1197_s3 = int_to_ptr.vmem [resolvable:$true] %s1196_s3 }
 0xd0f   :  { %s1476_s16 = scalar_lea.vmem %s1197_s3, 32  ;;  %p1481_p1 = scmp.lt.s32.totalorder %s1197_s3, %s1197_s3 }
 0xd10   :  { %803 = vrot.lane.b32.xlu1 %v801_v0, %s1501_s2  ;;  %p1477_p0 = scmp.ne.s32.totalorder %s1197_s3, %s1476_s16  ;;  %p1482_p2 = scmp.lt.s32.totalorder %s1476_s16, %s1476_s16 }
 0xd12   :  { %p1483_p3 = por %p1482_p2, %p1481_p1 }
 0xd14   :  { %p1484_p4 = pnand %p1483_p3, %p1477_p0 }
 0xd82   :  { %v804_v9 = vpop.permute.xlu1 %803 }
 0xd83   :  { %1372 = vmatmul.mubr.msk.f32.vlgmr.msra.gmra.mxu1 %vm303_vm4, %v804_v9 }
 0xd84   :  { %1386 = vmatpush3.msra.mxu1 %v1551_v1  ;;  %1393 = vmatprep.mubr.msk.f32.mxu1 %vm1499_vm3, %v1498_v4 }
 0xd85   :  { %1387 = vmatprep.subr.mxu1 %v1498_v4 }
 0xd86   :  { %1388 = vmatpush3.msra.mxu1 %v1560_v5 }
 0xd87   :  { %1389 = vmatprep.subr.mxu1 %v1498_v4 }
 0xd88   :  { %1390 = vmatpush3.msra.mxu1 %v1580_v11 }
 0xd89   :  { %1391 = vmatprep.subr.mxu1 %v1498_v4 }
 0xd8a   :  { %1392 = vmatpush3.msra.mxu1 %v1595_v14 }
 0xe43   :  { %v873_v22 = vpop.f32.mrf.mxu1 }
 0xe44   :  { %v877_v1 = vadd.f32 %v873_v22, %v290_v18 }
 0xe45   :  { %v1373_v23 = vpop.f32.mrf.mxu1 }
 0xe46   :  { %1452 = vtanh.f32 %v877_v1  ;;  %v1230_v25 = vmul.f32 -1.442695, %v877_v1 }
 0xe48   :  { %1454 = vpow2.f32 %v1230_v25 }
 0xe53   :  { %v1453_v24 = vpop.eup %1452 }
 0xe54   :  { %887 = vrot.lane.b32.xlu0 %v1453_v24, %s1500_s18 }
 0xe55   :  { %v1455_v5 = vpop.eup %1454 }
 0xe56   :  { %v881_v26 = vadd.f32 1.0, %v1455_v5 }
 0xe58   :  { %1456 = vrcp.f32 %v881_v26 }
 0xe65   :  { %v1457_v11 = vpop.eup %1456 }
 0xe66   :  { %v885_v14 = vmul.f32 %v1457_v11, %v795_v15  ;;  %v1235_v15 = vld [vmem:[%s1838_s4] ss:$0 sm:$0xff] }
 0xec6   :  { %v888_v27 = vpop.permute.xlu0 %887 }
 0xec7   :  { %v890_v28 = vmul.f32 %v1457_v11, %v888_v27 }
 0xec9   :  { %892 = vrot.lane.b32.xlu1 %v890_v28, %s1501_s2 }
 0xf3b   :  { %v893_v29 = vpop.permute.xlu1 %892 }
 0xf3c   :  { %v895_v17 = vadd.f32 %v893_v29, %v885_v14 }
 0xf3e   :  { %1458 = vtanh.f32 %v895_v17 }
 0xf4b   :  { %v1459_v30 = vpop.eup %1458 }
 0xf4c   :  { %898 = vrot.lane.b32.xlu0 %v1459_v30, %s1500_s18 }
 0xfbe   :  { %v899_v31 = vpop.permute.xlu0 %898 }
 0xfbf   :  { %v901_v32 = vmul.f32 %v1457_v11, %v899_v31 }
 0xfc1   :  { %903 = vrot.lane.b32.xlu1 %v901_v32, %s1501_s2 }
0x1033   :  { %v904_v33 = vpop.permute.xlu1 %903 }
0x1034   :  { %1383 = vmatmul.mubr.msk.f32.vlgmr.msra.gmra.mxu0 %vm303_vm4, %v904_v33 }
0x1035   :  { %1404 = vmatprep.mubr.msk.f32.mxu0 %vm1499_vm3, %v1498_v4  ;;  %1397 = vmatpush3.msra.mxu0 %v1105_v20 }
0x1036   :  { %1398 = vmatprep.subr.mxu0 %v1498_v4 }
0x1037   :  { %1399 = vmatpush3.msra.mxu0 %v1104_v2 }
0x1038   :  { %1400 = vmatprep.subr.mxu0 %v1498_v4 }
0x1039   :  { %1401 = vmatpush3.msra.mxu0 %v1103_v3 }
0x103a   :  { %1402 = vmatprep.subr.mxu0 %v1498_v4 }
0x103b   :  { %1403 = vmatpush3.msra.mxu0 %v1102_v6 }
0x10f4   :  { %v973_v35 = vpop.f32.mrf.mxu0 }
0x10f5   :  { %v977_v36 = vadd.f32 %v973_v35, %v295_v34 }
0x10f6   :  { %v1384_v37 = vpop.f32.mrf.mxu0 }
0x10f7   :  { %1460 = vtanh.f32 %v977_v36  ;;  %v1232_v39 = vmul.f32 -1.442695, %v977_v36 }
0x10f9   :  { %1462 = vpow2.f32 %v1232_v39 }
0x1104   :  { %v1461_v38 = vpop.eup %1460 }
0x1105   :  { %987 = vrot.lane.b32.xlu0 %v1461_v38, %s1500_s18 }
0x1106   :  { %v1463_v40 = vpop.eup %1462 }
0x1107   :  { %v981_v41 = vadd.f32 1.0, %v1463_v40 }
0x1109   :  { %1464 = vrcp.f32 %v981_v41 }
0x1116   :  { %v1465_v42 = vpop.eup %1464 }
0x1117   :  { %v985_v45 = vmul.f32 %v1465_v42, %v895_v17 }
0x1177   :  { %v988_v43 = vpop.permute.xlu0 %987 }
0x1178   :  { %v990_v44 = vmul.f32 %v1465_v42, %v988_v43 }
0x117a   :  { %992 = vrot.lane.b32.xlu1 %v990_v44, %s1501_s2 }
0x11ec   :  { %v993_v46 = vpop.permute.xlu1 %992 }
0x11ed   :  { %v995_v21 = vadd.f32 %v993_v46, %v985_v45 }
0x11ef   :  { %1466 = vtanh.f32 %v995_v21 }
0x11fc   :  { %v1467_v47 = vpop.eup %1466 }
0x11fd   :  { %998 = vrot.lane.b32.xlu0 %v1467_v47, %s1500_s18 }
0x126f   :  { %v999_v48 = vpop.permute.xlu0 %998 }
0x1270   :  { %v1001_v49 = vmul.f32 %v1465_v42, %v999_v48 }
0x1272   :  { %1003 = vrot.lane.b32.xlu1 %v1001_v49, %s1501_s2 }
0x12e4   :  { %v1004_v50 = vpop.permute.xlu1 %1003 }
0x12e5   :  { %1394 = vmatmul.mubr.msk.f32.vlgmr.msra.gmra.mxu1 %vm303_vm4, %v1004_v50 }
0x13a5   :  { %v1073_v52 = vpop.f32.mrf.mxu1 }
0x13a6   :  { %v1077_v53 = vadd.f32 %v1073_v52, %v300_v51 }
0x13a7   :  { %v1395_v54 = vpop.f32.mrf.mxu1 }
0x13a8   :  { %1468 = vtanh.f32 %v1077_v53  ;;  %v1234_v56 = vmul.f32 -1.442695, %v1077_v53 }
0x13aa   :  { %1470 = vpow2.f32 %v1234_v56 }
0x13b5   :  { %v1469_v55 = vpop.eup %1468 }
0x13b6   :  { %1087 = vrot.lane.b32.xlu0 %v1469_v55, %s1500_s18 }
0x13b7   :  { %v1471_v57 = vpop.eup %1470 }
0x13b8   :  { %v1081_v58 = vadd.f32 1.0, %v1471_v57 }
0x13ba   :  { %1472 = vrcp.f32 %v1081_v58 }
0x13c7   :  { %v1473_v59 = vpop.eup %1472 }
0x13c8   :  { %v1085_v62 = vmul.f32 %v1473_v59, %v995_v21 }
0x1428   :  { %v1088_v60 = vpop.permute.xlu0 %1087 }
0x1429   :  { %v1090_v61 = vmul.f32 %v1473_v59, %v1088_v60 }
0x142b   :  { %1092 = vrot.lane.b32.xlu1 %v1090_v61, %s1501_s2 }
0x149d   :  { %v1093_v63 = vpop.permute.xlu1 %1092 }
0x149e   :  { %v1095_v19 = vadd.f32 %v1093_v63, %v1085_v62 }
0x14a0   :  { %1474 = vtanh.f32 %v1095_v19 }
0x14ad   :  { %v1475_v7 = vpop.eup %1474 }
0x14ae   :  { %1098 = vrot.lane.b32.xlu0 %v1475_v7, %s1500_s18 }
0x1520   :  { %v1099_v10 = vpop.permute.xlu0 %1098 }
0x1521   :  { %v1101_v12 = vmul.f32 %v1473_v59, %v1099_v10 }
0x1523   :  { %1114 = vrot.lane.b32.xlu1 %v1101_v12, %s1501_s2 }
0x1595   :  { %v1115_v13 = vpop.permute.xlu1 %1114 }
0x1596   :  { %1405 = vmatmul.mubr.msk.f32.vlgmr.msra.gmra.mxu0 %vm303_vm4, %v1115_v13 }
0x1656   :  { %v1184_v16 = vpop.f32.mrf.mxu0 }
0x1657   :  { %v1185_v4 = vadd.f32 %v1235_v15, %v1184_v16 }
0x1658   :  { %v1406_v8 = vpop.f32.mrf.mxu0 }
0x1659   :  { %1189 = vst.msk [vmem:[#allocation7] sm:$0x3] %vm1188_vm5, %v1185_v4 }
0x165a   :  { %1487 = shalt.err (!%p1484_p4)
}
0x165b   :  { %1199 = dma.vmem_to_hbm [thread:$0]  %s1197_s3, 32, %s1841_s7, [#allocation8]  }
0x165c   :  { %1496 = dma.done.wait [#allocation8], 32  }
0x165d   :  { %1497 = vsyncadd [#allocation8], 4294967264 }
0x165e   :  { %1203 = vsyncpa [#allocation8], 1 }

</bundles_post_ra>
